<compile_context>
chip_gen: v7x
topology: tpu7x:2x2x1
jax: 0.10.0
libtpu: 0.0.40
codegen_flags: <defaults>
</compile_context>

<pallas_src>
import functools

import jax
import jax.numpy as jnp
import numpy as np
from jax.experimental import pallas as pl
from jax.experimental.pallas import tpu as pltpu


# ----------------------------- Pallas kernel --------------------------------


def decoder_kernel(x_ref, h_ref, sup_ref, wg_ref, wc_ref, wp_ref, bias_ref,
                   out_ref, hid_ref, *, num_supports, max_step,
                   input_dim, num_units):
    S, K, I, U = num_supports, max_step, input_dim, num_units
    x = x_ref[...]                        # (R, I)   R = batch * num_nodes, f32
    h = h_ref[...]                        # (R, U)   previous hidden state, f32
    A = sup_ref[...]                      # (S*R, S*R) block-diag diffusion supports
    R = x.shape[0]

    def cheb_stack(v):
        """Lane-concatenated diffusion stack [T0(v) | s0:T1..TK | s1:T1..TK | ...].

        All (support, batch) pairs run their Chebyshev recurrence on one
        row-stacked state, so each diffusion hop is a single MXU push.
        """
        pieces = [v]
        if S > 0 and K > 0:
            v0 = jnp.concatenate([v] * S, axis=0)          # (S*R, width) row tile
            mats = []
            v1 = jnp.dot(A, v0, preferred_element_type=jnp.float32)
            mats.append(v1)
            for _ in range(2, K + 1):
                v2 = 2.0 * jnp.dot(A, v1, preferred_element_type=jnp.float32) - v0
                mats.append(v2)
                v1, v0 = v2, v1
            for s in range(S):
                for mat in mats:
                    pieces.append(mat[s * R:(s + 1) * R, :])
        # NOTE: lane offsets here are multiples of D=34 (not 128-aligned); if a
        # bundle dump shows relayout copies, switch to 128-lane slabs with
        # zero-padded weight rows (free MXU padding) per the perf review.
        return jnp.concatenate(pieces, axis=-1)

    bias = bias_ref[...]                  # (1, 2U + U + I) packed biases
    b_gate = bias[:, :2 * U]
    b_cand = bias[:, 2 * U:3 * U]
    b_proj = bias[:, 3 * U:3 * U + I]

    # --- gate diffusion conv: one fused (R, M*D) @ (M*D, 2U) dot ---
    xh = jnp.concatenate([x, h], axis=-1)                  # (R, D)
    g = jax.nn.sigmoid(
        jnp.dot(cheb_stack(xh), wg_ref[...], preferred_element_type=jnp.float32)
        + b_gate)                                          # (R, 2U)
    r = g[:, :U]
    u = g[:, U:2 * U]

    # --- candidate diffusion conv on concat(x, r*h) with the full W_cand ---
    cand_in = jnp.concatenate([x, r * h], axis=-1)         # (R, D)
    c = jnp.tanh(
        jnp.dot(cheb_stack(cand_in), wc_ref[...], preferred_element_type=jnp.float32)
        + b_cand)                                          # (R, U)

    # --- GRU blend (f32 elementwise) + projection Linear(U, I) ---
    new_h = u * h + (1.0 - u) * c                          # (R, U)
    hid_ref[...] = new_h
    out_ref[...] = (jnp.dot(new_h, wp_ref[...], preferred_element_type=jnp.float32)
                    + b_proj)                              # (R, I)


# ------------------------------- wrapper -------------------------------------


def decoder_pallas(inputs, hidden_state, params):
    cfg = params["cfg"]
    N, U, I = cfg["num_nodes"], cfg["num_units"], cfg["output_dim"]
    K, S = cfg["max_diffusion_step"], cfg["num_supports"]
    D = I + U
    M = S * K + 1
    B = inputs.shape[0]
    R = B * N

    x_rows = inputs.reshape(B, N, I).reshape(R, I).astype(jnp.float32)
    h_rows = hidden_state[0].reshape(B, N, U).reshape(R, U).astype(jnp.float32)

    # Block-diagonal supports over (support, batch): block (s*B + b) = A_s.
    sup = params["supports"].astype(jnp.float32)                     # (S, N, N)
    sup_big = jax.scipy.linalg.block_diag(
        *[sup[s] for s in range(S) for _ in range(B)])               # (S*R, S*R)

    def reorder(W):
        # torch row layout d*M + m (feature-major) -> m*D + d (matrix-major),
        # matching the lane-concatenation order of the cheb stack in the kernel.
        out = W.shape[-1]
        return jnp.transpose(W.reshape(D, M, out), (1, 0, 2)).reshape(M * D, out)

    wg = reorder(params["W_gate"]).astype(jnp.float32)               # (M*D, 2U)
    wc = reorder(params["W_cand"]).astype(jnp.float32)               # (M*D, U)
    wp = params["W_proj"].T.astype(jnp.float32)                      # (U, I)
    bias = jnp.concatenate(
        [params["b_gate"], params["b_cand"], params["b_proj"]],
        axis=0).reshape(1, 2 * U + U + I).astype(jnp.float32)        # (1, 2U+U+I)

    kernel = functools.partial(decoder_kernel, num_supports=S, max_step=K,
                               input_dim=I, num_units=U)

    def full(shape):
        nd = len(shape)
        return pl.BlockSpec(shape, lambda i: (0,) * nd)

    out, new_h = pl.pallas_call(
        kernel,
        grid=(1,),
        in_specs=[
            full((R, I)),                     # x
            full((R, U)),                     # h
            full((S * R, S * R)),             # block-diag supports
            full((M * D, 2 * U)),             # gate weights (reordered)
            full((M * D, U)),                 # candidate weights (reordered)
            full((U, I)),                     # projection weights
            full((1, 2 * U + U + I)),         # packed biases
        ],
        out_specs=[
            full((R, I)),
            full((R, U)),
        ],
        out_shape=[
            jax.ShapeDtypeStruct((R, I), jnp.float32),
            jax.ShapeDtypeStruct((R, U), jnp.float32),
        ],
        compiler_params=pltpu.CompilerParams(dimension_semantics=("arbitrary",)),
    )(x_rows, h_rows, sup_big, wg, wc, wp, bias)

    output = out.reshape(B, N * I)            # (B, num_nodes * output_dim)
    hidden = new_h.reshape(1, B, N * U)       # torch.stack over num_layers=1
    return output, hidden


# --------------------- pure-JAX reference (torch semantics) ------------------


def _ref_dconv(x_bni, h_bnu, sup, W, b, max_step):
    B, N, I = x_bni.shape
    U = h_bnu.shape[-1]
    cat = jnp.concatenate([x_bni, h_bnu], axis=-1)          # (B, N, D)
    D = I + U
    x0 = jnp.transpose(cat, (1, 2, 0)).reshape(N, D * B)
    mats = [x0]
    for s in range(sup.shape[0]):
        A = sup[s]
        v0 = x0
        v1 = A @ v0
        mats.append(v1)
        for _ in range(2, max_step + 1):
            v2 = 2.0 * (A @ v1) - v0
            mats.append(v2)
            v1, v0 = v2, v1
    M = len(mats)
    x = jnp.stack(mats, axis=0).reshape(M, N, D, B)
    x = jnp.transpose(x, (3, 1, 2, 0)).reshape(B * N, D * M)
    out = x @ W + b
    return out.reshape(B, N, -1)


def decoder_ref(inputs, hidden_state, params):
    cfg = params["cfg"]
    N, U, I, K = cfg["num_nodes"], cfg["num_units"], cfg["output_dim"], cfg["max_diffusion_step"]
    B = inputs.shape[0]
    sup = params["supports"]
    x = inputs.reshape(B, N, I)
    h = hidden_state[0].reshape(B, N, U)
    gate = jax.nn.sigmoid(_ref_dconv(x, h, sup, params["W_gate"], params["b_gate"], K))
    r, u = gate[..., :U], gate[..., U:]
    c = jnp.tanh(_ref_dconv(x, r * h, sup, params["W_cand"], params["b_cand"], K))
    new_h = u * h + (1.0 - u) * c
    proj = new_h.reshape(-1, U) @ params["W_proj"].T + params["b_proj"]
    return proj.reshape(B, N * I), new_h.reshape(1, B, N * U)


# ------------------------------ param init -----------------------------------


def init_params(key, *, num_nodes, num_units, output_dim, max_diffusion_step):
    N, U, I, K = num_nodes, num_units, output_dim, max_diffusion_step
    S = 2                                   # dual_random_walk -> two supports
    M = S * K + 1
    D = I + U
    ks = jax.random.split(key, 5)
    adj = jax.random.uniform(ks[0], (N, N), dtype=jnp.float32) + 0.1

    def random_walk(a):                     # D^{-1} A
        return a / jnp.sum(a, axis=1, keepdims=True)

    supports = jnp.stack([random_walk(adj).T, random_walk(adj.T).T], axis=0)

    scale = 0.1
    W_gate = jax.random.normal(ks[1], (D * M, 2 * U), jnp.float32) * scale
    W_cand = jax.random.normal(ks[2], (D * M, U), jnp.float32) * scale
    b_gate = jnp.full((2 * U,), 1.0, jnp.float32)      # bias_start=1.0 (gate)
    b_cand = jnp.zeros((U,), jnp.float32)              # bias_start=0.0 (candidate)
    W_proj = jax.random.normal(ks[3], (I, U), jnp.float32) * scale   # nn.Linear(U, I)
    b_proj = jax.random.normal(ks[4], (I,), jnp.float32) * scale

    cfg = dict(num_nodes=N, num_units=U, output_dim=I,
               max_diffusion_step=K, num_supports=S)
    return dict(cfg=cfg, supports=supports,
                W_gate=W_gate, b_gate=b_gate,
                W_cand=W_cand, b_cand=b_cand,
                W_proj=W_proj, b_proj=b_proj)


# --------------------------------- main ---------------------------------------


if __name__ == "__main__":
    # small shapes implied by the module: batch=2, num_nodes=16, num_units=32,
    # output_dim=2, max_diffusion_step=2, horizon=8 (unused in forward), 1 layer.
    B, N, U, I, K = 2, 16, 32, 2, 2
    num_layers = 1

    key = jax.random.PRNGKey(0)
    kp, kx, kh = jax.random.split(key, 3)
    params = init_params(kp, num_nodes=N, num_units=U, output_dim=I,
                         max_diffusion_step=K)

    inputs = jax.random.normal(kx, (B, N * I), jnp.float32)          # (B, N*output_dim)
    hidden_state = jax.random.normal(kh, (num_layers, B, N * U), jnp.float32)

    out, new_hidden = decoder_pallas(inputs, hidden_state, params)
    jax.block_until_ready((out, new_hidden))

    ref_out, ref_hidden = decoder_ref(inputs, hidden_state, params)
    assert out.shape == (B, N * I) and new_hidden.shape == (num_layers, B, N * U)
    # All-f32 state; residual error is MXU default-precision operand rounding in
    # both kernel and reference.  Tolerance kept conservative.
    assert np.allclose(np.asarray(out), np.asarray(ref_out), atol=3e-2, rtol=3e-2)
    assert np.allclose(np.asarray(new_hidden), np.asarray(ref_hidden), atol=3e-2, rtol=3e-2)

    print("KERNEL_OK")
</pallas_src>

<mosaic_0001>
module attributes {stable_mosaic.version = 11 : i64} {
  func.func @decoder_kernel(%arg0: i32, %arg1: memref<32x2xf32, #tpu.memory_space<vmem>>, %arg2: memref<32x32xf32, #tpu.memory_space<vmem>>, %arg3: memref<64x64xf32, #tpu.memory_space<vmem>>, %arg4: memref<170x64xf32, #tpu.memory_space<vmem>>, %arg5: memref<170x32xf32, #tpu.memory_space<vmem>>, %arg6: memref<32x2xf32, #tpu.memory_space<vmem>>, %arg7: memref<1x98xf32, #tpu.memory_space<vmem>>, %arg8: memref<32x2xf32, #tpu.memory_space<vmem>>, %arg9: memref<32x32xf32, #tpu.memory_space<vmem>>) attributes {dimension_semantics = [#tpu.dimension_semantics<arbitrary>], iteration_bounds = array<i64: 1>, scalar_prefetch = 0 : i64, scratch_operands = 0 : i64, tpu.core_type = #tpu.core_type<tc>, window_params = [{pipeline_mode = #tpu.pipeline_mode<synchronous>, transform_indices = @transform_0, window_bounds = array<i64: 32, 2>}, {pipeline_mode = #tpu.pipeline_mode<synchronous>, transform_indices = @transform_1, window_bounds = array<i64: 32, 32>}, {pipeline_mode = #tpu.pipeline_mode<synchronous>, transform_indices = @transform_2, window_bounds = array<i64: 64, 64>}, {pipeline_mode = #tpu.pipeline_mode<synchronous>, transform_indices = @transform_3, window_bounds = array<i64: 170, 64>}, {pipeline_mode = #tpu.pipeline_mode<synchronous>, transform_indices = @transform_4, window_bounds = array<i64: 170, 32>}, {pipeline_mode = #tpu.pipeline_mode<synchronous>, transform_indices = @transform_5, window_bounds = array<i64: 32, 2>}, {pipeline_mode = #tpu.pipeline_mode<synchronous>, transform_indices = @transform_6, window_bounds = array<i64: 1, 98>}, {pipeline_mode = #tpu.pipeline_mode<synchronous>, transform_indices = @transform_7, window_bounds = array<i64: 32, 2>}, {pipeline_mode = #tpu.pipeline_mode<synchronous>, transform_indices = @transform_8, window_bounds = array<i64: 32, 32>}]} {
    %c0 = arith.constant 0 : index
    %c0_0 = arith.constant 0 : index
    %0 = vector.load %arg1[%c0, %c0_0] : memref<32x2xf32, #tpu.memory_space<vmem>>, vector<32x2xf32>
    %c0_1 = arith.constant 0 : index
    %c0_2 = arith.constant 0 : index
    %1 = vector.load %arg2[%c0_1, %c0_2] : memref<32x32xf32, #tpu.memory_space<vmem>>, vector<32x32xf32>
    %c0_3 = arith.constant 0 : index
    %c0_4 = arith.constant 0 : index
    %2 = vector.load %arg3[%c0_3, %c0_4] : memref<64x64xf32, #tpu.memory_space<vmem>>, vector<64x64xf32>
    %c0_5 = arith.constant 0 : index
    %c0_6 = arith.constant 0 : index
    %3 = vector.load %arg7[%c0_5, %c0_6] : memref<1x98xf32, #tpu.memory_space<vmem>>, vector<1x98xf32>
    %4 = vector.extract_strided_slice %3 {offsets = [0, 0], sizes = [1, 64], strides = [1, 1]} : vector<1x98xf32> to vector<1x64xf32>
    %5 = vector.extract_strided_slice %3 {offsets = [0, 64], sizes = [1, 32], strides = [1, 1]} : vector<1x98xf32> to vector<1x32xf32>
    %6 = vector.extract_strided_slice %3 {offsets = [0, 96], sizes = [1, 2], strides = [1, 1]} : vector<1x98xf32> to vector<1x2xf32>
    %7 = tpu.concatenate %0, %1 in 1 : vector<32x2xf32>, vector<32x32xf32> -> vector<32x34xf32>
    %8 = tpu.concatenate %7, %7 in 0 : vector<32x34xf32>, vector<32x34xf32> -> vector<64x34xf32>
    %cst = arith.constant dense<0.000000e+00> : vector<64x34xf32>
    %9 = tpu.matmul %2, %8, %cst {dimension_numbers = #tpu.dot_dimension_numbers<[1], [0], [0], [1], [0, 0, 1, 1], [], []>} : vector<64x64xf32>, vector<64x34xf32>, vector<64x34xf32> -> vector<64x34xf32>
    %cst_7 = arith.constant dense<0.000000e+00> : vector<64x34xf32>
    %10 = tpu.matmul %2, %9, %cst_7 {dimension_numbers = #tpu.dot_dimension_numbers<[1], [0], [0], [1], [0, 0, 1, 1], [], []>} : vector<64x64xf32>, vector<64x34xf32>, vector<64x34xf32> -> vector<64x34xf32>
    %cst_8 = arith.constant 2.000000e+00 : f32
    %11 = vector.broadcast %cst_8 : f32 to vector<64x34xf32>
    %12 = arith.mulf %11, %10 : vector<64x34xf32>
    %13 = arith.subf %12, %8 : vector<64x34xf32>
    %14 = vector.extract_strided_slice %9 {offsets = [0, 0], sizes = [32, 34], strides = [1, 1]} : vector<64x34xf32> to vector<32x34xf32>
    %15 = vector.extract_strided_slice %13 {offsets = [0, 0], sizes = [32, 34], strides = [1, 1]} : vector<64x34xf32> to vector<32x34xf32>
    %16 = vector.extract_strided_slice %9 {offsets = [32, 0], sizes = [32, 34], strides = [1, 1]} : vector<64x34xf32> to vector<32x34xf32>
    %17 = vector.extract_strided_slice %13 {offsets = [32, 0], sizes = [32, 34], strides = [1, 1]} : vector<64x34xf32> to vector<32x34xf32>
    %18 = tpu.concatenate %7, %14, %15, %16, %17 in 1 : vector<32x34xf32>, vector<32x34xf32>, vector<32x34xf32>, vector<32x34xf32>, vector<32x34xf32> -> vector<32x170xf32>
    %c0_9 = arith.constant 0 : index
    %c0_10 = arith.constant 0 : index
    %19 = vector.load %arg4[%c0_9, %c0_10] : memref<170x64xf32, #tpu.memory_space<vmem>>, vector<170x64xf32>
    %cst_11 = arith.constant dense<0.000000e+00> : vector<32x64xf32>
    %20 = tpu.matmul %18, %19, %cst_11 {dimension_numbers = #tpu.dot_dimension_numbers<[1], [0], [0], [1], [0, 0, 1, 1], [], []>} : vector<32x170xf32>, vector<170x64xf32>, vector<32x64xf32> -> vector<32x64xf32>
    %21 = vector.broadcast %4 : vector<1x64xf32> to vector<32x64xf32>
    %22 = arith.addf %20, %21 : vector<32x64xf32>
    %23 = arith.negf %22 : vector<32x64xf32>
    %24 = math.exp %23 : vector<32x64xf32>
    %cst_12 = arith.constant 1.000000e+00 : f32
    %25 = vector.broadcast %cst_12 : f32 to vector<32x64xf32>
    %26 = arith.addf %25, %24 : vector<32x64xf32>
    %27 = arith.divf %25, %26 : vector<32x64xf32>
    %28 = vector.extract_strided_slice %27 {offsets = [0, 0], sizes = [32, 32], strides = [1, 1]} : vector<32x64xf32> to vector<32x32xf32>
    %29 = vector.extract_strided_slice %27 {offsets = [0, 32], sizes = [32, 32], strides = [1, 1]} : vector<32x64xf32> to vector<32x32xf32>
    %30 = arith.mulf %28, %1 : vector<32x32xf32>
    %31 = tpu.concatenate %0, %30 in 1 : vector<32x2xf32>, vector<32x32xf32> -> vector<32x34xf32>
    %32 = tpu.concatenate %31, %31 in 0 : vector<32x34xf32>, vector<32x34xf32> -> vector<64x34xf32>
    %cst_13 = arith.constant dense<0.000000e+00> : vector<64x34xf32>
    %33 = tpu.matmul %2, %32, %cst_13 {dimension_numbers = #tpu.dot_dimension_numbers<[1], [0], [0], [1], [0, 0, 1, 1], [], []>} : vector<64x64xf32>, vector<64x34xf32>, vector<64x34xf32> -> vector<64x34xf32>
    %cst_14 = arith.constant dense<0.000000e+00> : vector<64x34xf32>
    %34 = tpu.matmul %2, %33, %cst_14 {dimension_numbers = #tpu.dot_dimension_numbers<[1], [0], [0], [1], [0, 0, 1, 1], [], []>} : vector<64x64xf32>, vector<64x34xf32>, vector<64x34xf32> -> vector<64x34xf32>
    %cst_15 = arith.constant 2.000000e+00 : f32
    %35 = vector.broadcast %cst_15 : f32 to vector<64x34xf32>
    %36 = arith.mulf %35, %34 : vector<64x34xf32>
    %37 = arith.subf %36, %32 : vector<64x34xf32>
    %38 = vector.extract_strided_slice %33 {offsets = [0, 0], sizes = [32, 34], strides = [1, 1]} : vector<64x34xf32> to vector<32x34xf32>
    %39 = vector.extract_strided_slice %37 {offsets = [0, 0], sizes = [32, 34], strides = [1, 1]} : vector<64x34xf32> to vector<32x34xf32>
    %40 = vector.extract_strided_slice %33 {offsets = [32, 0], sizes = [32, 34], strides = [1, 1]} : vector<64x34xf32> to vector<32x34xf32>
    %41 = vector.extract_strided_slice %37 {offsets = [32, 0], sizes = [32, 34], strides = [1, 1]} : vector<64x34xf32> to vector<32x34xf32>
    %42 = tpu.concatenate %31, %38, %39, %40, %41 in 1 : vector<32x34xf32>, vector<32x34xf32>, vector<32x34xf32>, vector<32x34xf32>, vector<32x34xf32> -> vector<32x170xf32>
    %c0_16 = arith.constant 0 : index
    %c0_17 = arith.constant 0 : index
    %43 = vector.load %arg5[%c0_16, %c0_17] : memref<170x32xf32, #tpu.memory_space<vmem>>, vector<170x32xf32>
    %cst_18 = arith.constant dense<0.000000e+00> : vector<32x32xf32>
    %44 = tpu.matmul %42, %43, %cst_18 {dimension_numbers = #tpu.dot_dimension_numbers<[1], [0], [0], [1], [0, 0, 1, 1], [], []>} : vector<32x170xf32>, vector<170x32xf32>, vector<32x32xf32> -> vector<32x32xf32>
    %45 = vector.broadcast %5 : vector<1x32xf32> to vector<32x32xf32>
    %46 = arith.addf %44, %45 : vector<32x32xf32>
    %47 = math.tanh %46 : vector<32x32xf32>
    %48 = arith.mulf %29, %1 : vector<32x32xf32>
    %cst_19 = arith.constant 1.000000e+00 : f32
    %49 = vector.broadcast %cst_19 : f32 to vector<32x32xf32>
    %50 = arith.subf %49, %29 : vector<32x32xf32>
    %51 = arith.mulf %50, %47 : vector<32x32xf32>
    %52 = arith.addf %48, %51 : vector<32x32xf32>
    %c0_20 = arith.constant 0 : index
    %c0_21 = arith.constant 0 : index
    %53 = vector.load %arg9[%c0_20, %c0_21] : memref<32x32xf32, #tpu.memory_space<vmem>>, vector<32x32xf32>
    tpu.vector_store %arg9[%c0_20, %c0_21], %52 {strides = array<i32>} : memref<32x32xf32, #tpu.memory_space<vmem>>, vector<32x32xf32>,
    %c0_22 = arith.constant 0 : index
    %c0_23 = arith.constant 0 : index
    %54 = vector.load %arg6[%c0_22, %c0_23] : memref<32x2xf32, #tpu.memory_space<vmem>>, vector<32x2xf32>
    %cst_24 = arith.constant dense<0.000000e+00> : vector<32x2xf32>
    %55 = tpu.matmul %52, %54, %cst_24 {dimension_numbers = #tpu.dot_dimension_numbers<[1], [0], [0], [1], [0, 0, 1, 1], [], []>} : vector<32x32xf32>, vector<32x2xf32>, vector<32x2xf32> -> vector<32x2xf32>
    %56 = vector.broadcast %6 : vector<1x2xf32> to vector<32x2xf32>
    %57 = arith.addf %55, %56 : vector<32x2xf32>
    %c0_25 = arith.constant 0 : index
    %c0_26 = arith.constant 0 : index
    %58 = vector.load %arg8[%c0_25, %c0_26] : memref<32x2xf32, #tpu.memory_space<vmem>>, vector<32x2xf32>
    tpu.vector_store %arg8[%c0_25, %c0_26], %57 {strides = array<i32>} : memref<32x2xf32, #tpu.memory_space<vmem>>, vector<32x2xf32>,
    return
  }
  func.func @transform_0(%arg0: i32) -> (i32, i32) {
    %c0_i32 = arith.constant 0 : i32
    %c0_i32_0 = arith.constant 0 : i32
    %c0_i32_1 = arith.constant 0 : i32
    return %c0_i32, %c0_i32_0 : i32, i32
  }
  func.func @transform_1(%arg0: i32) -> (i32, i32) {
    %c0_i32 = arith.constant 0 : i32
    %c0_i32_0 = arith.constant 0 : i32
    %c0_i32_1 = arith.constant 0 : i32
    return %c0_i32, %c0_i32_0 : i32, i32
  }
  func.func @transform_2(%arg0: i32) -> (i32, i32) {
    %c0_i32 = arith.constant 0 : i32
    %c0_i32_0 = arith.constant 0 : i32
    %c0_i32_1 = arith.constant 0 : i32
    return %c0_i32, %c0_i32_0 : i32, i32
  }
  func.func @transform_3(%arg0: i32) -> (i32, i32) {
    %c0_i32 = arith.constant 0 : i32
    %c0_i32_0 = arith.constant 0 : i32
    %c0_i32_1 = arith.constant 0 : i32
    return %c0_i32, %c0_i32_0 : i32, i32
  }
  func.func @transform_4(%arg0: i32) -> (i32, i32) {
    %c0_i32 = arith.constant 0 : i32
    %c0_i32_0 = arith.constant 0 : i32
    %c0_i32_1 = arith.constant 0 : i32
    return %c0_i32, %c0_i32_0 : i32, i32
  }
  func.func @transform_5(%arg0: i32) -> (i32, i32) {
    %c0_i32 = arith.constant 0 : i32
    %c0_i32_0 = arith.constant 0 : i32
    %c0_i32_1 = arith.constant 0 : i32
    return %c0_i32, %c0_i32_0 : i32, i32
  }
  func.func @transform_6(%arg0: i32) -> (i32, i32) {
    %c0_i32 = arith.constant 0 : i32
    %c0_i32_0 = arith.constant 0 : i32
    %c0_i32_1 = arith.constant 0 : i32
    return %c0_i32, %c0_i32_0 : i32, i32
  }
  func.func @transform_7(%arg0: i32) -> (i32, i32) {
    %c0_i32 = arith.constant 0 : i32
    %c0_i32_0 = arith.constant 0 : i32
    %c0_i32_1 = arith.constant 0 : i32
    return %c0_i32, %c0_i32_0 : i32, i32
  }
  func.func @transform_8(%arg0: i32) -> (i32, i32) {
    %c0_i32 = arith.constant 0 : i32
    %c0_i32_0 = arith.constant 0 : i32
    %c0_i32_1 = arith.constant 0 : i32
    return %c0_i32, %c0_i32_0 : i32, i32
  }
}

</mosaic_0001>

<bundles_post_ra>
// kernel: tpu_custom_call.1
= control target key start
LH: loop header
LB: loop body
LE: loop exit
PB: predicated region body
PF: predicated region fallthrough
CT: control target
= control target key end

     0   :  { %s1697_s9 = smov 2   ;;  %s2289_s0 = inlined_call_operand.vmem [shape: f32[32,2], index: 0, kind: input, shape index: {}]   ;;  %s2290_s1 = inlined_call_operand.vmem [shape: f32[32,32], index: 1, kind: input, shape index: {}]   ;;  %s2291_s2 = inlined_call_operand.vmem [shape: f32[64,64], index: 2, kind: input, shape index: {}]   ;;  %s2292_s3 = inlined_call_operand.vmem [shape: f32[170,64], index: 3, kind: input, shape index: {}]   ;;  %s2293_s4 = inlined_call_operand.vmem [shape: f32[170,32], index: 4, kind: input, shape index: {}]   ;;  %s2294_s5 = inlined_call_operand.vmem [shape: f32[32,2], index: 5, kind: input, shape index: {}]   ;;  %s2295_s6 = inlined_call_operand.vmem [shape: f32[1,98], index: 6, kind: input, shape index: {}]   ;;  %s2296_s7 = inlined_call_operand.vmem [shape: f32[32,2], index: 7, kind: output, shape index: {0}]   ;;  %s2297_s8 = inlined_call_operand.hbm [shape: f32[32,32], index: 8, kind: output, shape index: {1}]  }
   0x1   :  { %v1757_v0 = vld [vmem:[%s2290_s1 + $0x10] sm:$0xff]  ;;  %v1762_v1 = vld [vmem:[%s2290_s1] sm:$0xff]  ;;  %v1771_v2 = vld [vmem:[%s2290_s1 + $0x18] sm:$0xff] }
   0x2   :  { %54 = vrot.lane.b32.xlu1 %v1757_v0, %s1697_s9  ;;  %50 = vrot.lane.b32.xlu0 %v1762_v1, %s1697_s9  ;;  %v1776_v3 = vld [vmem:[%s2290_s1 + $0x8] sm:$0xff] }
   0x3   :  { %14 = vsyncpa [#allocation3], 0  ;;  %v1785_v4 = vld [vmem:[%s2291_s2] sm:$0xff]  ;;  %vm67_vm0 = vcmask 523264   ;;  %v1794_v7 = vld [vmem:[%s2289_s0 + $0x10] sm:$0xff]  ;;  %vm62_vm1 = vcmask 15360  }
   0x4   :  { %1343 = vmatprep.mubr.msk.f32.mxu0 %vm67_vm0, %v1785_v4  ;;  %1399 = vmatprep.mubr.msk.f32.mxu1 %vm67_vm0, %v1785_v4  ;;  %v1799_v8 = vld [vmem:[%s2289_s0] sm:$0xff]  ;;  %v1804_v9 = vld [vmem:[%s2289_s0 + $0x18] sm:$0xff]  ;;  %v1809_v10 = vld [vmem:[%s2289_s0 + $0x8] sm:$0xff]  ;;  %s1698_s15 = smov 34   ;;  %v1700_v43 = vmov 0.0|0.0   ;;  %vm443_vm2 = vcmask 1041408  }
   0x5   :  { %v1834_v19 = vld [vmem:[%s2291_s2 + $0x8] sm:$0xff]  ;;  %v1839_v20 = vld [vmem:[%s2291_s2 + $0x10] sm:$0xff]  ;;  %v1848_v21 = vld [vmem:[%s2291_s2 + $0x18] sm:$0xff]  ;;  %vm1701_vm3 = vmmov 1   ;;  %s1703_s1 = smov 8   ;;  %vm382_vm5 = vcmask 277504  }
   0x6   :  { %56 = vrot.lane.b32.xlu1 %v1771_v2, %s1697_s9  ;;  %52 = vrot.lane.b32.xlu0 %v1776_v3, %s1697_s9  ;;  %v1853_v22 = vld [vmem:[%s2291_s2 + $0x20] sm:$0xff]  ;;  %v1862_v23 = vld [vmem:[%s2291_s2 + $0x28] sm:$0xff]  ;;  %vm1979_vm4 = vmpackc.low %vm443_vm2, %vm1701_vm3  ;;  %vm387_vm6 = vcmask 556032   ;;  %vm430_vm7 = vcmask 343040   ;;  %vm392_vm8 = vcmask 834560   ;;  %vm397_vm9 = vcmask 64512  }
   0x7   :  { %v1867_v24 = vld [vmem:[%s2291_s2 + $0x30] sm:$0xff]  ;;  %v1876_v25 = vld [vmem:[%s2291_s2 + $0x38] sm:$0xff]  ;;  %s1699_s2 = smov 102   ;;  %v402_v40 = vld [vmem:[%s2292_s3] sm:$0xff]  ;;  %vm1075_vm10 = vcmask 261120   ;;  %s1707_s18 = smov [#allocation2]  }
   0x8   :  { %v403_v41 = vld [vmem:[%s2292_s3 + $0x8] sm:$0xff]  ;;  %v404_v42 = vld [vmem:[%s2292_s3 + $0x10] sm:$0xff]  ;;  %v405_v45 = vld [vmem:[%s2292_s3 + $0x18] sm:$0xff]  ;;  %s1191_s19 = sshll.u32 %s1707_s18, 4  ;;  %s1192_s19 = int_to_ptr.vmem [resolvable:$true] %s1191_s19 }
   0x9   :  { %v1486_v44 = vpack.c.bf16 %v403_v41, %v402_v40  ;;  %v1489_v46 = vpack.c.bf16 %v405_v45, %v404_v42  ;;  %v406_v47 = vld [vmem:[%s2292_s3 + $0x20] sm:$0xff]  ;;  %v407_v48 = vld [vmem:[%s2292_s3 + $0x28] sm:$0xff]  ;;  %v408_v50 = vld [vmem:[%s2292_s3 + $0x30] sm:$0xff]  ;;  %s1673_s20 = scalar_lea.vmem %s1192_s19, 512  ;;  %p1678_p1 = scmp.lt.s32.totalorder %s1192_s19, %s1192_s19 }
   0xa   :  { %v1492_v49 = vpack.c.bf16 %v407_v48, %v406_v47  ;;  %v409_v51 = vld [vmem:[%s2292_s3 + $0x38] sm:$0xff]  ;;  %v410_v53 = vld [vmem:[%s2292_s3 + $0x40] sm:$0xff]  ;;  %v411_v54 = vld [vmem:[%s2292_s3 + $0x48] sm:$0xff]  ;;  %p1674_p0 = scmp.ne.s32.totalorder %s1192_s19, %s1673_s20  ;;  %p1679_p2 = scmp.lt.s32.totalorder %s1673_s20, %s1673_s20 }
   0xb   :  { %v1495_v52 = vpack.c.bf16 %v409_v51, %v408_v50  ;;  %v1498_v55 = vpack.c.bf16 %v411_v54, %v410_v53  ;;  %v412_v56 = vld [vmem:[%s2292_s3 + $0x50] sm:$0xff]  ;;  %v413_v57 = vld [vmem:[%s2292_s3 + $0x58] sm:$0xff]  ;;  %v414_v59 = vld [vmem:[%s2292_s3 + $0x60] sm:$0xff] }
   0xc   :  { %v1501_v58 = vpack.c.bf16 %v413_v57, %v412_v56  ;;  %v415_v60 = vld [vmem:[%s2292_s3 + $0x68] sm:$0xff]  ;;  %v416_v62 = vld [vmem:[%s2292_s3 + $0x70] sm:$0xff]  ;;  %v417_v63 = vld [vmem:[%s2292_s3 + $0x78] sm:$0xff]  ;;  %p1680_p3 = por %p1679_p2, %p1678_p1 }
   0xd   :  { %v1504_v61 = vpack.c.bf16 %v415_v60, %v414_v59 }
   0xe   :  { %p1681_p4 = pnand %p1680_p3, %p1674_p0 }
  0x74   :  { %v55_v5 = vpop.permute.xlu1 %54  ;;  %v51_v6 = vpop.permute.xlu0 %50 }
  0x75   :  { %v1813_v13 = vsel %vm62_vm1, %v1794_v7, %v55_v5  ;;  %v1817_v14 = vsel %vm62_vm1, %v1799_v8, %v51_v6  ;;  %v1507_v5 = vpack.c.bf16 %v417_v63, %v416_v62  ;;  %v418_v6 = vld [vmem:[%s2292_s3 + $0x80] sm:$0xff] }
  0x78   :  { %v57_v11 = vpop.permute.xlu1 %56  ;;  %v53_v12 = vpop.permute.xlu0 %52 }
  0x79   :  { %v1821_v15 = vsel %vm62_vm1, %v1804_v9, %v57_v11  ;;  %v1825_v16 = vsel %vm62_vm1, %v1809_v10, %v53_v12  ;;  %v419_v11 = vld [vmem:[%s2292_s3 + $0x88] sm:$0xff] }
  0x7a   :  { %v1453_v17 = vpack.c.bf16 %v1825_v16, %v1817_v14  ;;  %v1457_v18 = vpack.c.bf16 %v1821_v15, %v1813_v13  ;;  %v1510_v12 = vpack.c.bf16 %v419_v11, %v418_v6 }
  0x7c   :  { %1454 = vmatprep.subr.bf16.mxu0 %v1453_v17 }
  0x7d   :  { %1456 = vmatpush3.bf16.msra.mxu0 %v1453_v17 }
  0x7e   :  { %1458 = vmatprep.subr.bf16.mxu0 %v1457_v18 }
  0x81   :  { %1460 = vmatpush3.bf16.msra.mxu0 %v1457_v18 }
  0x82   :  { %1462 = vmatprep.subr.bf16.mxu0 %v1453_v17 }
  0x85   :  { %1464 = vmatpush3.bf16.msra.mxu0 %v1453_v17  ;;  %v420_v17 = vld [vmem:[%s2292_s3 + $0x90] sm:$0xff] }
  0x86   :  { %1466 = vmatprep.subr.bf16.mxu0 %v1457_v18 }
  0x89   :  { %1468 = vmatpush3.bf16.msra.mxu0 %v1457_v18  ;;  %v421_v18 = vld [vmem:[%s2292_s3 + $0x98] sm:$0xff] }
  0x8c   :  { %1344 = vmatmul.mubr.msk.f32.vlgmr.msra.gmra.mrb[0].mxu0 %vm67_vm0, %v1834_v19 }
  0x8d   :  { %1346 = vmatprep.mubr.msk.f32.mxu0 %vm67_vm0, %v1839_v20 }
  0x90   :  { %1347 = vmatmul.mubr.msk.f32.gmra.mrb[2].mxu0 %vm67_vm0, %v1848_v21 }
  0x91   :  { %1349 = vmatprep.mubr.msk.f32.mxu0 %vm67_vm0, %v1853_v22 }
  0x94   :  { %1350 = vmatmul.mubr.msk.f32.gmra.mrb[4].mxu0 %vm67_vm0, %v1862_v23 }
  0x95   :  { %1352 = vmatprep.mubr.msk.f32.mxu0 %vm67_vm0, %v1867_v24 }
  0x98   :  { %1353 = vmatmul.mubr.msk.f32.gmra.mrb[6].mxu0 %vm67_vm0, %v1876_v25 }
  0x99   :  { %1371 = vmatprep.mubr.msk.f32.mxu0 %vm67_vm0, %v1785_v4 }
 0x15f   :  { %v1345_v26 = vpop.f32.mrb[0].mxu0 }
 0x160   :  { %v158_v27 = vpop.f32.mrb[1].mxu0 }
 0x161   :  { %v1609_v28 = vpack.i.bf16 %v1345_v26, %v158_v27  ;;  %v1469_v29 = vpack.c.bf16 %v1345_v26, %v158_v27  ;;  %v1513_v26 = vpack.c.bf16 %v421_v18, %v420_v17 }
 0x163   :  { %1610 = vrot.lane.b32.xlu0 %v1609_v28, %s1698_s15  ;;  %v1348_v30 = vpop.f32.mrb[2].mxu0  ;;  %1470 = vmatprep.subr.bf16.mxu0 %v1469_v29  ;;  %v422_v28 = vld [vmem:[%s2292_s3 + $0xa0] sm:$0xff] }
 0x164   :  { %v168_v31 = vpop.f32.mrb[3].mxu0  ;;  %1472 = vmatpush3.bf16.msra.mxu0 %v1469_v29  ;;  %v423_v29 = vld [vmem:[%s2292_s3 + $0xa8] sm:$0x3]  ;;  %s1702_s3 = smov 68  }
 0x165   :  { %v1614_v32 = vpack.i.bf16 %v1348_v30, %v168_v31  ;;  %v1473_v33 = vpack.c.bf16 %v1348_v30, %v168_v31 }
 0x167   :  { %v1351_v34 = vpop.f32.mrb[4].mxu0  ;;  %1474 = vmatprep.subr.bf16.mxu0 %v1473_v33 }
 0x168   :  { %1476 = vmatpush3.bf16.msra.mxu0 %v1473_v33  ;;  %356 = vrot.lane.b32.xlu0 %v1351_v34, %s1699_s2  ;;  %v178_v35 = vpop.f32.mrb[5].mxu0 }
 0x169   :  { %v1477_v36 = vpack.c.bf16 %v1351_v34, %v178_v35 }
 0x16b   :  { %v1354_v37 = vpop.f32.mrb[6].mxu0  ;;  %1478 = vmatprep.subr.bf16.mxu0 %v1477_v36 }
 0x16c   :  { %354 = vrot.lane.b32.xlu0 %v178_v35, %s1699_s2  ;;  %v188_v38 = vpop.f32.mrb[7].mxu0  ;;  %1480 = vmatpush3.bf16.msra.mxu0 %v1477_v36 }
 0x16d   :  { %v1481_v39 = vpack.c.bf16 %v1354_v37, %v188_v38 }
 0x16f   :  { %1482 = vmatprep.subr.bf16.mxu0 %v1481_v39 }
 0x170   :  { %1615 = vrot.lane.b32.xlu0 %v1614_v32, %s1698_s15  ;;  %1484 = vmatpush3.bf16.msra.mxu0 %v1481_v39  ;;  %v1516_v32 = vpack.c.bf16 %v423_v29, %v422_v28 }
 0x171   :  { %1485 = vmatprep.subr.bf16.mxu0 %v1700_v43 }
 0x173   :  { %1372 = vmatmul.mubr.msk.f32.vlgmr.msra.gmra.mrb[8].mxu0 %vm67_vm0, %v1834_v19 }
 0x174   :  { %358 = vrot.lane.b32.xlu0 %v188_v38, %s1699_s2  ;;  %1374 = vmatprep.mubr.msk.f32.mxu0 %vm67_vm0, %v1839_v20 }
 0x175   :  { %1487 = vmatpush1.bf16.msra.mxu0 %v1486_v44 }
 0x176   :  { %1488 = vmatprep.subr.bf16.mxu0 %v1700_v43 }
 0x177   :  { %1375 = vmatmul.mubr.msk.f32.gmra.mrb[10].mxu0 %vm67_vm0, %v1848_v21 }
 0x178   :  { %360 = vrot.lane.b32.xlu0 %v1354_v37, %s1699_s2  ;;  %1377 = vmatprep.mubr.msk.f32.mxu0 %vm67_vm0, %v1853_v22 }
 0x179   :  { %1490 = vmatpush1.bf16.msra.mxu0 %v1489_v46 }
 0x17a   :  { %1491 = vmatprep.subr.bf16.mxu0 %v1700_v43 }
 0x17b   :  { %1378 = vmatmul.mubr.msk.f32.gmra.mrb[12].mxu0 %vm67_vm0, %v1862_v23 }
 0x17c   :  { %1380 = vmatprep.mubr.msk.f32.mxu0 %vm67_vm0, %v1867_v24 }
 0x17d   :  { %1493 = vmatpush1.bf16.msra.mxu0 %v1492_v49 }
 0x17e   :  { %1494 = vmatprep.subr.bf16.mxu0 %v1700_v43 }
 0x17f   :  { %1381 = vmatmul.mubr.msk.f32.gmra.mrb[14].mxu0 %vm67_vm0, %v1876_v25 }
 0x181   :  { %1496 = vmatpush1.bf16.msra.mxu0 %v1495_v52 }
 0x182   :  { %1497 = vmatprep.subr.bf16.mxu0 %v1700_v43 }
 0x185   :  { %1499 = vmatpush1.bf16.msra.mxu0 %v1498_v55 }
 0x186   :  { %1500 = vmatprep.subr.bf16.mxu0 %v1700_v43 }
 0x189   :  { %1502 = vmatpush1.bf16.msra.mxu0 %v1501_v58 }
 0x18a   :  { %1503 = vmatprep.subr.bf16.mxu0 %v1700_v43 }
 0x18d   :  { %1505 = vmatpush1.bf16.msra.mxu0 %v1504_v61 }
 0x18e   :  { %1506 = vmatprep.subr.bf16.mxu0 %v1700_v43 }
 0x191   :  { %1508 = vmatpush1.bf16.msra.mxu0 %v1507_v5 }
 0x192   :  { %1509 = vmatprep.subr.bf16.mxu0 %v1700_v43 }
 0x195   :  { %1511 = vmatpush1.bf16.msra.mxu0 %v1510_v12 }
 0x196   :  { %1512 = vmatprep.subr.bf16.mxu0 %v1700_v43 }
 0x199   :  { %1514 = vmatpush1.bf16.msra.mxu0 %v1513_v26 }
 0x19a   :  { %1515 = vmatprep.subr.bf16.mxu0 %v1700_v43 }
 0x19d   :  { %1518 = vmatpush1.bf16.msk.msra.mxu0 %vm1979_vm4, %v1516_v32 }
 0x1d5   :  { %v1611_v58 = vpop.permute.xlu0 %1610 }
 0x1d6   :  { %v1612_v62 = vunpack.i.l.bf16 %v1611_v58  ;;  %v1613_v6 = vunpack.i.h.bf16 %v1611_v58 }
 0x1d8   :  { %v383_v11 = vsel %vm382_vm5, %v1817_v14, %v1612_v62 }
 0x1da   :  { %v357_v59 = vpop.permute.xlu0 %356 }
 0x1de   :  { %v355_v61 = vpop.permute.xlu0 %354 }
 0x1e2   :  { %v1616_v12 = vpop.permute.xlu0 %1615 }
 0x1e3   :  { %v1617_v28 = vunpack.i.l.bf16 %v1616_v12 }
 0x246   :  { %v1373_v27 = vpop.f32.mrb[8].mxu0 }
 0x247   :  { %v303_v30 = vmul.f32 2.0, %v1373_v27  ;;  %v263_v31 = vpop.f32.mrb[9].mxu0 }
 0x248   :  { %v302_v34 = vmul.f32 2.0, %v263_v31 }
 0x249   :  { %v311_v35 = vsub.f32 %v303_v30, %v1825_v16  ;;  %v384_v30 = vsel %vm382_vm5, %v1825_v16, %v1613_v6 }
 0x24a   :  { %v310_v36 = vsub.f32 %v302_v34, %v1817_v14  ;;  %v1376_v37 = vpop.f32.mrb[10].mxu0 }
 0x24b   :  { %v305_v38 = vmul.f32 2.0, %v1376_v37  ;;  %v273_v39 = vpop.f32.mrb[11].mxu0 }
 0x24c   :  { %v304_v40 = vmul.f32 2.0, %v273_v39  ;;  %v1619_v41 = vpack.i.bf16 %v311_v35, %v310_v36  ;;  %v1618_v35 = vunpack.i.h.bf16 %v1616_v12  ;;  %v359_v36 = vpop.permute.xlu0 %358 }
 0x24d   :  { %v313_v42 = vsub.f32 %v305_v38, %v1821_v15  ;;  %v385_v38 = vsel %vm382_vm5, %v1813_v13, %v1617_v28 }
 0x24e   :  { %v312_v44 = vsub.f32 %v304_v40, %v1813_v13  ;;  %1620 = vrot.lane.b32.xlu1 %v1619_v41, %s1702_s3  ;;  %v1379_v45 = vpop.f32.mrb[12].mxu0 }
 0x24f   :  { %v307_v46 = vmul.f32 2.0, %v1379_v45  ;;  %v283_v47 = vpop.f32.mrb[13].mxu0 }
 0x250   :  { %v1624_v48 = vpack.i.bf16 %v313_v42, %v312_v44  ;;  %v306_v50 = vmul.f32 2.0, %v283_v47  ;;  %v386_v44 = vsel %vm382_vm5, %v1821_v15, %v1618_v35 }
 0x251   :  { %v315_v49 = vsub.f32 %v307_v46, %v1825_v16  ;;  %v361_v46 = vpop.permute.xlu0 %360 }
 0x252   :  { %v1382_v51 = vpop.f32.mrb[14].mxu0  ;;  %v314_v53 = vsub.f32 %v306_v50, %v1817_v14 }
 0x253   :  { %372 = vrot.lane.b32.xlu1 %v315_v49, %s1703_s1  ;;  %v293_v52 = vpop.f32.mrb[15].mxu0  ;;  %v309_v55 = vmul.f32 2.0, %v1382_v51  ;;  %v2026_v49 = vld [vmem:[%s2295_s6] ss:$0 sm:$0xff]  ;;  %s1704_s6 = smov 64  }
 0x254   :  { %v308_v54 = vmul.f32 2.0, %v293_v52 }
 0x255   :  { %v317_v57 = vsub.f32 %v309_v55, %v1821_v15 }
 0x256   :  { %v316_v56 = vsub.f32 %v308_v54, %v1813_v13 }
 0x257   :  { %370 = vrot.lane.b32.xlu1 %v314_v53, %s1703_s1 }
 0x25b   :  { %1625 = vrot.lane.b32.xlu1 %v1624_v48, %s1702_s3 }
 0x25f   :  { %374 = vrot.lane.b32.xlu1 %v316_v56, %s1703_s1 }
 0x263   :  { %376 = vrot.lane.b32.xlu1 %v317_v57, %s1703_s1 }
 0x2c0   :  { %v1621_v60 = vpop.permute.xlu1 %1620 }
 0x2c1   :  { %v1622_v63 = vunpack.i.l.bf16 %v1621_v60  ;;  %v1623_v17 = vunpack.i.h.bf16 %v1621_v60 }
 0x2c3   :  { %v388_v18 = vsel %vm387_vm6, %v383_v11, %v1622_v63  ;;  %v389_v31 = vsel %vm387_vm6, %v384_v30, %v1623_v17 }
 0x2c4   :  { %v393_v29 = vsel %vm392_vm8, %v388_v18, %v355_v61  ;;  %v394_v37 = vsel %vm392_vm8, %v389_v31, %v357_v59 }
 0x2c5   :  { %v373_v5 = vpop.permute.xlu1 %372 }
 0x2c6   :  { %v399_v14 = vsel %vm397_vm9, %v357_v59, %v373_v5 }
 0x2c9   :  { %v371_v26 = vpop.permute.xlu1 %370 }
 0x2ca   :  { %v398_v27 = vsel %vm397_vm9, %v355_v61, %v371_v26 }
 0x2cb   :  { %1222 = vmatprep.mubr.msk.f32.mxu0 %vm430_vm7, %v398_v27 }
 0x2cc   :  { %512 = vmatmul.mubr.f32.vlgmr.msra.gmra.mrb[16].mxu0 %v393_v29 }
 0x2cd   :  { %1223 = vmatprep.mubr.msk.f32.mxu0 %vm430_vm7, %v399_v14  ;;  %v1626_v32 = vpop.permute.xlu1 %1625 }
 0x2ce   :  { %v1627_v34 = vunpack.i.l.bf16 %v1626_v32  ;;  %v1628_v39 = vunpack.i.h.bf16 %v1626_v32 }
 0x2d0   :  { %517 = vmatmul.mubr.f32.gmra.mrb[18].mxu0 %v394_v37  ;;  %v390_v16 = vsel %vm387_vm6, %v385_v38, %v1627_v34  ;;  %v391_v45 = vsel %vm387_vm6, %v386_v44, %v1628_v39 }
 0x2d1   :  { %v375_v40 = vpop.permute.xlu1 %374  ;;  %v395_v42 = vsel %vm392_vm8, %v390_v16, %v359_v36  ;;  %v396_v48 = vsel %vm392_vm8, %v391_v45, %v361_v46 }
 0x2d2   :  { %v400_v41 = vsel %vm397_vm9, %v359_v36, %v375_v40 }
 0x2d3   :  { %1224 = vmatprep.mubr.msk.f32.mxu0 %vm430_vm7, %v400_v41 }
 0x2d4   :  { %522 = vmatmul.mubr.f32.gmra.mrb[20].mxu0 %v395_v42 }
 0x2d5   :  { %v377_v47 = vpop.permute.xlu1 %376 }
 0x2d6   :  { %v401_v13 = vsel %vm397_vm9, %v361_v46, %v377_v47 }
 0x2d7   :  { %1225 = vmatprep.mubr.msk.f32.mxu0 %vm430_vm7, %v401_v13 }
 0x2d8   :  { %527 = vmatmul.mubr.f32.gmra.mrb[22].mxu0 %v396_v48 }
 0x39f   :  { %v513_v50 = vpop.f32.mrb[16].mxu0 }
 0x3a0   :  { %v514_v15 = vadd.f32 %v2026_v49, %v513_v50  ;;  %v515_v51 = vpop.f32.mrb[17].mxu0 }
 0x3a2   :  { %v1226_v52 = vmul.f32 -1.442695, %v514_v15 }
 0x3a3   :  { %v518_v53 = vpop.f32.mrb[18].mxu0 }
 0x3a4   :  { %1649 = vpow2.f32 %v1226_v52  ;;  %v519_v54 = vadd.f32 %v2026_v49, %v518_v53  ;;  %v520_v55 = vpop.f32.mrb[19].mxu0 }
 0x3a5   :  { %v892_v55 = vld [vmem:[%s2293_s4 + $0x30] sm:$0xff] }
 0x3a6   :  { %v1227_v56 = vmul.f32 -1.442695, %v519_v54 }
 0x3a7   :  { %v523_v57 = vpop.f32.mrb[20].mxu0 }
 0x3a8   :  { %1651 = vpow2.f32 %v1227_v56  ;;  %v524_v58 = vadd.f32 %v2026_v49, %v523_v57  ;;  %v525_v59 = vpop.f32.mrb[21].mxu0  ;;  %v893_v56 = vld [vmem:[%s2293_s4 + $0x38] sm:$0xff] }
 0x3a9   :  { %v1561_v57 = vpack.c.bf16 %v893_v56, %v892_v55  ;;  %v895_v59 = vld [vmem:[%s2293_s4 + $0x48] sm:$0xff] }
 0x3aa   :  { %v1228_v60 = vmul.f32 -1.442695, %v524_v58  ;;  %v894_v58 = vld [vmem:[%s2293_s4 + $0x40] sm:$0xff] }
 0x3ab   :  { %v528_v61 = vpop.f32.mrb[22].mxu0 }
 0x3ac   :  { %1653 = vpow2.f32 %v1228_v60  ;;  %v529_v62 = vadd.f32 %v2026_v49, %v528_v61  ;;  %v530_v63 = vpop.f32.mrb[23].mxu0  ;;  %v1564_v60 = vpack.c.bf16 %v895_v59, %v894_v58  ;;  %v896_v61 = vld [vmem:[%s2293_s4 + $0x50] sm:$0xff] }
 0x3ae   :  { %v1650_v5 = vpop.eup %1649  ;;  %v1229_v6 = vmul.f32 -1.442695, %v529_v62  ;;  %v897_v62 = vld [vmem:[%s2293_s4 + $0x58] sm:$0xff] }
 0x3af   :  { %v544_v11 = vadd.f32 1.0, %v1650_v5  ;;  %v1567_v63 = vpack.c.bf16 %v897_v62, %v896_v61  ;;  %v898_v5 = vld [vmem:[%s2293_s4 + $0x60] sm:$0xff] }
 0x3b0   :  { %1655 = vpow2.f32 %v1229_v6  ;;  %v899_v6 = vld [vmem:[%s2293_s4 + $0x68] sm:$0xff] }
 0x3b1   :  { %1657 = vrcp.f32 %v544_v11  ;;  %v1570_v11 = vpack.c.bf16 %v899_v6, %v898_v5 }
 0x3b2   :  { %v1652_v12 = vpop.eup %1651 }
 0x3b3   :  { %v545_v17 = vadd.f32 1.0, %v1652_v12  ;;  %v900_v12 = vld [vmem:[%s2293_s4 + $0x70] sm:$0xff] }
 0x3b5   :  { %1659 = vrcp.f32 %v545_v17  ;;  %v901_v17 = vld [vmem:[%s2293_s4 + $0x78] sm:$0xff] }
 0x3b6   :  { %v1654_v18 = vpop.eup %1653 }
 0x3b7   :  { %v546_v26 = vadd.f32 1.0, %v1654_v18  ;;  %v1573_v18 = vpack.c.bf16 %v901_v17, %v900_v12 }
 0x3b9   :  { %1661 = vrcp.f32 %v546_v26  ;;  %v902_v26 = vld [vmem:[%s2293_s4 + $0x80] sm:$0xff] }
 0x3ba   :  { %v1656_v27 = vpop.eup %1655 }
 0x3bb   :  { %v2032_v28 = vpop.eup %1657  ;;  %v547_v29 = vadd.f32 1.0, %v1656_v27  ;;  %v903_v27 = vld [vmem:[%s2293_s4 + $0x88] sm:$0xff] }
 0x3bc   :  { %v556_v30 = vmul.f32 %v2032_v28, %v1762_v1 }
 0x3bd   :  { %1663 = vrcp.f32 %v547_v29  ;;  %v1576_v29 = vpack.c.bf16 %v903_v27, %v902_v26 }
 0x3be   :  { %564 = vrot.lane.b32.xlu0 %v556_v30, %s1697_s9  ;;  %v904_v30 = vld [vmem:[%s2293_s4 + $0x90] sm:$0xff] }
 0x3bf   :  { %v2037_v14 = vpop.eup %1659 }
 0x3c0   :  { %v557_v31 = vmul.f32 %v2037_v14, %v1776_v3 }
 0x3c2   :  { %566 = vrot.lane.b32.xlu1 %v557_v31, %s1697_s9  ;;  %v905_v31 = vld [vmem:[%s2293_s4 + $0x98] sm:$0xff] }
 0x3c3   :  { %v2042_v32 = vpop.eup %1661 }
 0x3c4   :  { %v558_v34 = vmul.f32 %v2042_v32, %v1757_v0 }
 0x3c6   :  { %568 = vrot.lane.b32.xlu0 %v558_v34, %s1697_s9  ;;  %v1579_v34 = vpack.c.bf16 %v905_v31, %v904_v30 }
 0x3c7   :  { %v2047_v35 = vpop.eup %1663 }
 0x3c8   :  { %v559_v36 = vmul.f32 %v2047_v35, %v1771_v2 }
 0x3ca   :  { %570 = vrot.lane.b32.xlu1 %v559_v36, %s1697_s9  ;;  %s1705_s9 = smov 32  }
 0x430   :  { %v565_v37 = vpop.permute.xlu0 %564 }
 0x431   :  { %v2054_v39 = vsel %vm62_vm1, %v1799_v8, %v565_v37  ;;  %v906_v37 = vld [vmem:[%s2293_s4 + $0xa0] sm:$0xff] }
 0x434   :  { %v567_v38 = vpop.permute.xlu1 %566 }
 0x435   :  { %v2058_v16 = vsel %vm62_vm1, %v1809_v10, %v567_v38  ;;  %v907_v38 = vld [vmem:[%s2293_s4 + $0xa8] sm:$0x3] }
 0x436   :  { %v1519_v40 = vpack.c.bf16 %v2058_v16, %v2054_v39 }
 0x438   :  { %1520 = vmatprep.subr.bf16.mxu1 %v1519_v40  ;;  %v569_v41 = vpop.permute.xlu0 %568 }
 0x439   :  { %1522 = vmatpush3.bf16.msra.mxu1 %v1519_v40  ;;  %v2064_v44 = vsel %vm62_vm1, %v1794_v7, %v569_v41 }
 0x43c   :  { %v571_v42 = vpop.permute.xlu1 %570 }
 0x43d   :  { %v2068_v45 = vsel %vm62_vm1, %v1804_v9, %v571_v42  ;;  %v1582_v42 = vpack.c.bf16 %v907_v38, %v906_v37 }
 0x43e   :  { %v1523_v8 = vpack.c.bf16 %v2068_v45, %v2064_v44 }
 0x440   :  { %1524 = vmatprep.subr.bf16.mxu1 %v1523_v8 }
 0x441   :  { %1526 = vmatpush3.bf16.msra.mxu1 %v1523_v8 }
 0x442   :  { %1528 = vmatprep.subr.bf16.mxu1 %v1519_v40 }
 0x445   :  { %1530 = vmatpush3.bf16.msra.mxu1 %v1519_v40 }
 0x446   :  { %1532 = vmatprep.subr.bf16.mxu1 %v1523_v8 }
 0x449   :  { %1534 = vmatpush3.bf16.msra.mxu1 %v1523_v8 }
 0x44c   :  { %1400 = vmatmul.mubr.msk.f32.vlgmr.msra.gmra.mrb[0].mxu1 %vm67_vm0, %v1834_v19 }
 0x44d   :  { %1402 = vmatprep.mubr.msk.f32.mxu1 %vm67_vm0, %v1839_v20 }
 0x450   :  { %1403 = vmatmul.mubr.msk.f32.gmra.mrb[2].mxu1 %vm67_vm0, %v1848_v21 }
 0x451   :  { %1405 = vmatprep.mubr.msk.f32.mxu1 %vm67_vm0, %v1853_v22 }
 0x454   :  { %1406 = vmatmul.mubr.msk.f32.gmra.mrb[4].mxu1 %vm67_vm0, %v1862_v23 }
 0x455   :  { %1408 = vmatprep.mubr.msk.f32.mxu1 %vm67_vm0, %v1867_v24 }
 0x458   :  { %1409 = vmatmul.mubr.msk.f32.gmra.mrb[6].mxu1 %vm67_vm0, %v1876_v25 }
 0x459   :  { %1427 = vmatprep.mubr.msk.f32.mxu1 %vm67_vm0, %v1785_v4 }
 0x51f   :  { %v1401_v7 = vpop.f32.mrb[0].mxu1 }
 0x520   :  { %v646_v9 = vpop.f32.mrb[1].mxu1 }
 0x521   :  { %v1629_v10 = vpack.i.bf16 %v1401_v7, %v646_v9  ;;  %v1535_v46 = vpack.c.bf16 %v1401_v7, %v646_v9 }
 0x523   :  { %1630 = vrot.lane.b32.xlu0 %v1629_v10, %s1698_s15  ;;  %v1404_v47 = vpop.f32.mrb[2].mxu1  ;;  %1536 = vmatprep.subr.bf16.mxu1 %v1535_v46 }
 0x524   :  { %v656_v13 = vpop.f32.mrb[3].mxu1  ;;  %1538 = vmatpush3.bf16.msra.mxu1 %v1535_v46 }
 0x525   :  { %v1634_v48 = vpack.i.bf16 %v1404_v47, %v656_v13  ;;  %v1539_v50 = vpack.c.bf16 %v1404_v47, %v656_v13 }
 0x527   :  { %v1407_v15 = vpop.f32.mrb[4].mxu1  ;;  %1540 = vmatprep.subr.bf16.mxu1 %v1539_v50 }
 0x528   :  { %1542 = vmatpush3.bf16.msra.mxu1 %v1539_v50  ;;  %844 = vrot.lane.b32.xlu0 %v1407_v15, %s1699_s2  ;;  %v666_v51 = vpop.f32.mrb[5].mxu1 }
 0x529   :  { %v1543_v52 = vpack.c.bf16 %v1407_v15, %v666_v51 }
 0x52b   :  { %v1410_v4 = vpop.f32.mrb[6].mxu1  ;;  %1544 = vmatprep.subr.bf16.mxu1 %v1543_v52 }
 0x52c   :  { %842 = vrot.lane.b32.xlu0 %v666_v51, %s1699_s2  ;;  %v676_v53 = vpop.f32.mrb[7].mxu1  ;;  %1546 = vmatpush3.bf16.msra.mxu1 %v1543_v52 }
 0x52d   :  { %v1547_v54 = vpack.c.bf16 %v1410_v4, %v676_v53 }
 0x52f   :  { %1548 = vmatprep.subr.bf16.mxu1 %v1547_v54 }
 0x530   :  { %1635 = vrot.lane.b32.xlu0 %v1634_v48, %s1698_s15  ;;  %1550 = vmatpush3.bf16.msra.mxu1 %v1547_v54 }
 0x531   :  { %1551 = vmatprep.subr.bf16.mxu1 %v1700_v43 }
 0x533   :  { %1428 = vmatmul.mubr.msk.f32.vlgmr.msra.gmra.mrb[8].mxu1 %vm67_vm0, %v1834_v19  ;;  %v886_v19 = vld [vmem:[%s2293_s4] sm:$0xff] }
 0x534   :  { %846 = vrot.lane.b32.xlu0 %v676_v53, %s1699_s2  ;;  %1430 = vmatprep.mubr.msk.f32.mxu1 %vm67_vm0, %v1839_v20  ;;  %v887_v20 = vld [vmem:[%s2293_s4 + $0x8] sm:$0xff] }
 0x537   :  { %1431 = vmatmul.mubr.msk.f32.gmra.mrb[10].mxu1 %vm67_vm0, %v1848_v21  ;;  %v888_v21 = vld [vmem:[%s2293_s4 + $0x10] sm:$0xff] }
 0x538   :  { %848 = vrot.lane.b32.xlu0 %v1410_v4, %s1699_s2  ;;  %1433 = vmatprep.mubr.msk.f32.mxu1 %vm67_vm0, %v1853_v22  ;;  %v1552_v22 = vpack.c.bf16 %v887_v20, %v886_v19 }
 0x53a   :  { %1553 = vmatpush1.bf16.msra.mxu1 %v1552_v22 }
 0x53b   :  { %1434 = vmatmul.mubr.msk.f32.gmra.mrb[12].mxu1 %vm67_vm0, %v1862_v23  ;;  %1554 = vmatprep.subr.bf16.mxu1 %v1700_v43 }
 0x53c   :  { %908 = vrot.lane.b32.xlu0 %v2026_v49, %s1704_s6  ;;  %1436 = vmatprep.mubr.msk.f32.mxu1 %vm67_vm0, %v1867_v24  ;;  %v891_v24 = vld [vmem:[%s2293_s4 + $0x28] sm:$0xff] }
 0x53f   :  { %1437 = vmatmul.mubr.msk.f32.gmra.mrb[14].mxu1 %vm67_vm0, %v1876_v25 }
 0x540   :  { %1019 = vrot.lane.b32.xlu0 %v1757_v0, %s1705_s9  ;;  %v889_v0 = vld [vmem:[%s2293_s4 + $0x18] sm:$0xff] }
 0x541   :  { %v1555_v23 = vpack.c.bf16 %v889_v0, %v888_v21 }
 0x543   :  { %1556 = vmatpush1.bf16.msra.mxu1 %v1555_v23 }
 0x544   :  { %1021 = vrot.lane.b32.xlu0 %v1771_v2, %s1705_s9  ;;  %v890_v2 = vld [vmem:[%s2293_s4 + $0x20] sm:$0xff]  ;;  %1557 = vmatprep.subr.bf16.mxu1 %v1700_v43 }
 0x545   :  { %v1558_v25 = vpack.c.bf16 %v891_v24, %v890_v2 }
 0x547   :  { %1559 = vmatpush1.bf16.msra.mxu1 %v1558_v25 }
 0x548   :  { %1560 = vmatprep.subr.bf16.mxu1 %v1700_v43 }
 0x54b   :  { %1562 = vmatpush1.bf16.msra.mxu1 %v1561_v57 }
 0x54c   :  { %1563 = vmatprep.subr.bf16.mxu1 %v1700_v43 }
 0x54f   :  { %1565 = vmatpush1.bf16.msra.mxu1 %v1564_v60 }
 0x550   :  { %1566 = vmatprep.subr.bf16.mxu1 %v1700_v43 }
 0x553   :  { %1568 = vmatpush1.bf16.msra.mxu1 %v1567_v63 }
 0x554   :  { %1569 = vmatprep.subr.bf16.mxu1 %v1700_v43 }
 0x557   :  { %1571 = vmatpush1.bf16.msra.mxu1 %v1570_v11 }
 0x558   :  { %1572 = vmatprep.subr.bf16.mxu1 %v1700_v43 }
 0x55b   :  { %1574 = vmatpush1.bf16.msra.mxu1 %v1573_v18 }
 0x55c   :  { %1575 = vmatprep.subr.bf16.mxu1 %v1700_v43 }
 0x55f   :  { %1577 = vmatpush1.bf16.msra.mxu1 %v1576_v29 }
 0x560   :  { %1578 = vmatprep.subr.bf16.mxu1 %v1700_v43 }
 0x563   :  { %1580 = vmatpush1.bf16.msra.mxu1 %v1579_v34 }
 0x564   :  { %1581 = vmatprep.subr.bf16.mxu1 %v1700_v43 }
 0x567   :  { %1584 = vmatpush1.bf16.msk.msra.mxu1 %vm1979_vm4, %v1582_v42 }
 0x595   :  { %v1631_v2 = vpop.permute.xlu0 %1630 }
 0x596   :  { %v1632_v56 = vunpack.i.l.bf16 %v1631_v2  ;;  %v1633_v59 = vunpack.i.h.bf16 %v1631_v2 }
 0x598   :  { %v870_v60 = vsel %vm382_vm5, %v2054_v39, %v1632_v56  ;;  %v871_v11 = vsel %vm382_vm5, %v2058_v16, %v1633_v59 }
 0x59a   :  { %v845_v24 = vpop.permute.xlu0 %844 }
 0x59e   :  { %v843_v55 = vpop.permute.xlu0 %842 }
 0x5a2   :  { %v1636_v61 = vpop.permute.xlu0 %1635 }
 0x5a3   :  { %v1637_v6 = vunpack.i.l.bf16 %v1636_v61  ;;  %v1638_v26 = vunpack.i.h.bf16 %v1636_v61 }
 0x5a5   :  { %v872_v30 = vsel %vm382_vm5, %v2064_v44, %v1637_v6  ;;  %v873_v38 = vsel %vm382_vm5, %v2068_v45, %v1638_v26  ;;  %v1033_v6 = vsub.f32 1.0, %v2042_v32 }
 0x5a6   :  { %v847_v27 = vpop.permute.xlu0 %846 }
 0x606   :  { %v1429_v36 = vpop.f32.mrb[8].mxu1 }
 0x607   :  { %v791_v40 = vmul.f32 2.0, %v1429_v36  ;;  %v751_v41 = vpop.f32.mrb[9].mxu1 }
 0x608   :  { %v790_v8 = vmul.f32 2.0, %v751_v41  ;;  %v849_v41 = vpop.permute.xlu0 %848 }
 0x609   :  { %v799_v7 = vsub.f32 %v791_v40, %v2058_v16 }
 0x60a   :  { %v798_v9 = vsub.f32 %v790_v8, %v2054_v39  ;;  %v1432_v43 = vpop.f32.mrb[10].mxu1 }
 0x60b   :  { %v793_v10 = vmul.f32 2.0, %v1432_v43  ;;  %v761_v46 = vpop.f32.mrb[11].mxu1 }
 0x60c   :  { %v792_v47 = vmul.f32 2.0, %v761_v46  ;;  %v1639_v13 = vpack.i.bf16 %v799_v7, %v798_v9  ;;  %v909_v7 = vpop.permute.xlu0 %908 }
 0x60d   :  { %v801_v48 = vsub.f32 %v793_v10, %v2068_v45 }
 0x60e   :  { %v800_v50 = vsub.f32 %v792_v47, %v2064_v44  ;;  %1640 = vrot.lane.b32.xlu1 %v1639_v13, %s1702_s3  ;;  %v1435_v15 = vpop.f32.mrb[12].mxu1 }
 0x60f   :  { %v795_v51 = vmul.f32 2.0, %v1435_v15  ;;  %v771_v52 = vpop.f32.mrb[13].mxu1 }
 0x610   :  { %v1644_v4 = vpack.i.bf16 %v801_v48, %v800_v50  ;;  %v794_v53 = vmul.f32 2.0, %v771_v52 }
 0x611   :  { %v803_v33 = vsub.f32 %v795_v51, %v2058_v16 }
 0x612   :  { %v1438_v54 = vpop.f32.mrb[14].mxu1  ;;  %v802_v20 = vsub.f32 %v794_v53, %v2054_v39  ;;  %v1080_v53 = vld [vmem:[%s2294_s5] sm:$0xff] }
 0x613   :  { %860 = vrot.lane.b32.xlu1 %v803_v33, %s1703_s1  ;;  %v781_v19 = vpop.f32.mrb[15].mxu1  ;;  %v797_v22 = vmul.f32 2.0, %v1438_v54  ;;  %v1081_v54 = vld [vmem:[%s2294_s5 + $0x8] sm:$0xff] }
 0x614   :  { %v796_v21 = vmul.f32 2.0, %v781_v19  ;;  %v1585_v19 = vpack.c.bf16 %v1081_v54, %v1080_v53 }
 0x615   :  { %v805_v23 = vsub.f32 %v797_v22, %v2068_v45  ;;  %v1082_v22 = vld [vmem:[%s2294_s5 + $0x10] sm:$0xff] }
 0x616   :  { %v804_v0 = vsub.f32 %v796_v21, %v2064_v44  ;;  %1586 = vmatprep.subr.bf16.mxu0 %v1585_v19  ;;  %1593 = vmatprep.subr.bf16.mxu1 %v1585_v19 }
 0x617   :  { %858 = vrot.lane.b32.xlu1 %v802_v20, %s1703_s1  ;;  %1588 = vmatpush3.bf16.msra.mxu0 %v1585_v19 }
 0x61b   :  { %1645 = vrot.lane.b32.xlu1 %v1644_v4, %s1702_s3 }
 0x61f   :  { %862 = vrot.lane.b32.xlu1 %v804_v0, %s1703_s1  ;;  %v1083_v0 = vld [vmem:[%s2294_s5 + $0x18] sm:$0xff]  ;;  %s1706_s5 = smov 96  }
 0x620   :  { %v1589_v2 = vpack.c.bf16 %v1083_v0, %v1082_v22 }
 0x622   :  { %1590 = vmatprep.subr.bf16.mxu0 %v1589_v2 }
 0x623   :  { %864 = vrot.lane.b32.xlu1 %v805_v23, %s1703_s1  ;;  %1592 = vmatpush3.bf16.msra.mxu0 %v1589_v2 }
 0x627   :  { %1015 = vrot.lane.b32.xlu1 %v1762_v1, %s1705_s9 }
 0x62b   :  { %1017 = vrot.lane.b32.xlu1 %v1776_v3, %s1705_s9 }
 0x680   :  { %v1641_v25 = vpop.permute.xlu1 %1640 }
 0x681   :  { %v1642_v57 = vunpack.i.l.bf16 %v1641_v25  ;;  %v1643_v62 = vunpack.i.h.bf16 %v1641_v25  ;;  %v1020_v25 = vpop.permute.xlu0 %1019 }
 0x683   :  { %v874_v63 = vsel %vm387_vm6, %v870_v60, %v1642_v57  ;;  %v875_v39 = vsel %vm387_vm6, %v871_v11, %v1643_v62  ;;  %v1032_v60 = vsub.f32 1.0, %v2037_v14  ;;  %v1029_v11 = vmul.f32 %v2042_v32, %v1020_v25 }
 0x684   :  { %v878_v3 = vsel %vm392_vm8, %v874_v63, %v843_v55  ;;  %v879_v29 = vsel %vm392_vm8, %v875_v39, %v845_v24  ;;  %v1034_v39 = vsub.f32 1.0, %v2047_v35 }
 0x685   :  { %v861_v58 = vpop.permute.xlu1 %860  ;;  %v1022_v61 = vpop.permute.xlu0 %1021 }
 0x686   :  { %v883_v12 = vsel %vm397_vm9, %v845_v24, %v861_v58 }
 0x689   :  { %v859_v5 = vpop.permute.xlu1 %858 }
 0x68a   :  { %v882_v1 = vsel %vm397_vm9, %v843_v55, %v859_v5  ;;  %v1031_v55 = vsub.f32 1.0, %v2032_v28 }
 0x68b   :  { %1247 = vmatprep.mubr.msk.f32.mxu1 %vm430_vm7, %v882_v1 }
 0x68c   :  { %991 = vmatmul.mubr.f32.vlgmr.msra.gmra.mrb[16].mxu1 %v878_v3 }
 0x68d   :  { %1248 = vmatprep.mubr.msk.f32.mxu1 %vm430_vm7, %v883_v12  ;;  %v1646_v17 = vpop.permute.xlu1 %1645  ;;  %1595 = vmatpush3.bf16.msra.mxu1 %v1585_v19 }
 0x68e   :  { %v1647_v18 = vunpack.i.l.bf16 %v1646_v17  ;;  %v1648_v31 = vunpack.i.h.bf16 %v1646_v17  ;;  %1594 = vmatprep.subr.bf16.mxu1 %v1589_v2 }
 0x690   :  { %996 = vmatmul.mubr.f32.gmra.mrb[18].mxu1 %v879_v29  ;;  %v876_v16 = vsel %vm387_vm6, %v872_v30, %v1647_v18  ;;  %v877_v40 = vsel %vm387_vm6, %v873_v38, %v1648_v31  ;;  %v1030_v18 = vmul.f32 %v2047_v35, %v1022_v61 }
 0x691   :  { %v863_v34 = vpop.permute.xlu1 %862  ;;  %v880_v37 = vsel %vm392_vm8, %v876_v16, %v847_v27  ;;  %v881_v8 = vsel %vm392_vm8, %v877_v40, %v849_v41  ;;  %1596 = vmatpush3.bf16.msra.mxu1 %v1589_v2 }
 0x692   :  { %v884_v36 = vsel %vm397_vm9, %v847_v27, %v863_v34 }
 0x693   :  { %1249 = vmatprep.mubr.msk.f32.mxu1 %vm430_vm7, %v884_v36 }
 0x694   :  { %1001 = vmatmul.mubr.f32.gmra.mrb[20].mxu1 %v880_v37 }
 0x695   :  { %v865_v42 = vpop.permute.xlu1 %864 }
 0x696   :  { %v885_v44 = vsel %vm397_vm9, %v849_v41, %v865_v42 }
 0x697   :  { %1250 = vmatprep.mubr.msk.f32.mxu1 %vm430_vm7, %v885_v44 }
 0x698   :  { %1006 = vmatmul.mubr.f32.gmra.mrb[22].mxu1 %v881_v8 }
 0x699   :  { %v1016_v23 = vpop.permute.xlu1 %1015 }
 0x69a   :  { %v1027_v57 = vmul.f32 %v2032_v28, %v1016_v23 }
 0x69d   :  { %v1018_v24 = vpop.permute.xlu1 %1017 }
 0x69e   :  { %v1028_v63 = vmul.f32 %v2037_v14, %v1018_v24 }
 0x75f   :  { %v992_v9 = vpop.f32.mrb[16].mxu1 }
 0x760   :  { %v993_v43 = vadd.f32 %v992_v9, %v909_v7  ;;  %v994_v10 = vpop.f32.mrb[17].mxu1 }
 0x762   :  { %1665 = vtanh.f32 %v993_v43 }
 0x763   :  { %v997_v46 = vpop.f32.mrb[18].mxu1 }
 0x764   :  { %v998_v47 = vadd.f32 %v997_v46, %v909_v7  ;;  %v999_v45 = vpop.f32.mrb[19].mxu1 }
 0x766   :  { %1667 = vtanh.f32 %v998_v47 }
 0x767   :  { %v1002_v13 = vpop.f32.mrb[20].mxu1 }
 0x768   :  { %v1003_v48 = vadd.f32 %v1002_v13, %v909_v7  ;;  %v1004_v50 = vpop.f32.mrb[21].mxu1 }
 0x76a   :  { %1669 = vtanh.f32 %v1003_v48 }
 0x76b   :  { %v1007_v15 = vpop.f32.mrb[22].mxu1 }
 0x76c   :  { %v1666_v51 = vpop.eup %1665  ;;  %v1008_v52 = vadd.f32 %v1007_v15, %v909_v7  ;;  %v1009_v4 = vpop.f32.mrb[23].mxu1 }
 0x76d   :  { %1039 = vrot.lane.b32.xlu1 %v1666_v51, %s1705_s9 }
 0x76e   :  { %1671 = vtanh.f32 %v1008_v52 }
 0x770   :  { %v1668_v33 = vpop.eup %1667 }
 0x771   :  { %1041 = vrot.lane.b32.xlu1 %v1668_v33, %s1705_s9 }
 0x774   :  { %v1670_v20 = vpop.eup %1669 }
 0x775   :  { %1043 = vrot.lane.b32.xlu0 %v1670_v20, %s1705_s9 }
 0x778   :  { %v1672_v21 = vpop.eup %1671 }
 0x779   :  { %1045 = vrot.lane.b32.xlu0 %v1672_v21, %s1705_s9 }
 0x7df   :  { %v1040_v56 = vpop.permute.xlu1 %1039 }
 0x7e0   :  { %v1051_v58 = vmul.f32 %v1040_v56, %v1031_v55 }
 0x7e2   :  { %v1055_v59 = vadd.f32 %v1051_v58, %v1027_v57 }
 0x7e3   :  { %v1042_v62 = vpop.permute.xlu1 %1041 }
 0x7e4   :  { %v1052_v5 = vmul.f32 %v1042_v62, %v1032_v60  ;;  %1063 = vrot.lane.b32.xlu1 %v1055_v59, %s1706_s5 }
 0x7e6   :  { %v1056_v1 = vadd.f32 %v1052_v5, %v1028_v63 }
 0x7e7   :  { %v1044_v3 = vpop.permute.xlu0 %1043 }
 0x7e8   :  { %v1053_v12 = vmul.f32 %v1044_v3, %v1033_v6  ;;  %1065 = vrot.lane.b32.xlu1 %v1056_v1, %s1706_s5 }
 0x7ea   :  { %v1057_v28 = vadd.f32 %v1053_v12, %v1029_v11 }
 0x7eb   :  { %v1046_v17 = vpop.permute.xlu0 %1045 }
 0x7ec   :  { %v1054_v26 = vmul.f32 %v1046_v17, %v1034_v39  ;;  %1067 = vrot.lane.b32.xlu0 %v1057_v28, %s1706_s5  ;;  %1084 = vrot.lane.b32.xlu1 %v2026_v49, %s1705_s9 }
 0x7ee   :  { %v1058_v14 = vadd.f32 %v1054_v26, %v1030_v18 }
 0x7f0   :  { %1069 = vrot.lane.b32.xlu0 %v1058_v14, %s1706_s5 }
 0x856   :  { %v1064_v27 = vpop.permute.xlu1 %1063 }
 0x857   :  { %1076 = vst.msk [vmem:[#allocation2] sm:$0xff] %vm1075_vm10, %v1064_v27  ;;  %1447 = vmatprep.mubr.msk.f32.mxu0 %vm1075_vm10, %v1064_v27 }
 0x85a   :  { %v1066_v32 = vpop.permute.xlu1 %1065 }
 0x85b   :  { %1077 = vst.msk [vmem:[#allocation2 + $0x8] sm:$0xff] %vm1075_vm10, %v1066_v32  ;;  %1448 = vmatmul.mubr.msk.f32.vlgmr.msra.gmra.mrb[24].mxu0 %vm1075_vm10, %v1066_v32 }
 0x85e   :  { %v1068_v29 = vpop.permute.xlu0 %1067 }
 0x85f   :  { %1078 = vst.msk [vmem:[#allocation2 + $0x10] sm:$0xff] %vm1075_vm10, %v1068_v29  ;;  %1450 = vmatprep.mubr.msk.f32.mxu1 %vm1075_vm10, %v1068_v29 }
 0x862   :  { %v1070_v30 = vpop.permute.xlu0 %1069 }
 0x863   :  { %1079 = vst.msk [vmem:[#allocation2 + $0x18] sm:$0xff] %vm1075_vm10, %v1070_v30  ;;  %1451 = vmatmul.mubr.msk.f32.vlgmr.msra.gmra.mrb[24].mxu1 %vm1075_vm10, %v1070_v30 }
 0x864   :  { %1684 = shalt.err (!%p1681_p4)
}
 0x865   :  { %s1685_s22 = scalar_lea.hbm %s2297_s8, 512 }
 0x866   :  { %p1686_p5 = scmp.ne.s32.totalorder %s2297_s8, %s1685_s22  ;;  %p1689_p6 = scmp.lt.u32.totalorder %s1685_s22, %s2297_s8 }
 0x868   :  { %p1691_p7 = pnand %p1689_p6, %p1686_p5 }
 0x86a   :  { %1694 = shalt.err (!%p1691_p7)
}
 0x86b   :  { %s1708_s26 = smov 128   ;;  %v1085_v49 = vpop.permute.xlu1 %1084 }
 0x86c   :  { %1197 = dma.vmem_to_hbm [thread:$0]  %s1192_s19, 512, %s2297_s8, [#allocation3], %s1708_s26, %s1708_s26, %s1703_s1  }
 0x92e   :  { %v1449_v35 = vpop.f32.mrb[24].mxu0 }
 0x92f   :  { %v1167_v31 = vadd.f32 %v1449_v35, %v1085_v49  ;;  %v1161_v16 = vpop.f32.mrb[25].mxu0 }
 0x930   :  { %v1162_v34 = vadd.f32 %v1161_v16, %v1085_v49 }
 0x931   :  { %1181 = vst.msk [vmem:[%s2296_s7 + $0x8] sm:$0xff] %vm62_vm1, %v1167_v31 }
 0x932   :  { %1180 = vst.msk [vmem:[%s2296_s7] sm:$0xff] %vm62_vm1, %v1162_v34 }
 0x936   :  { %v1452_v36 = vpop.f32.mrb[24].mxu1 }
 0x937   :  { %v1177_v37 = vadd.f32 %v1452_v36, %v1085_v49  ;;  %v1171_v38 = vpop.f32.mrb[25].mxu1 }
 0x938   :  { %v1172_v40 = vadd.f32 %v1171_v38, %v1085_v49 }
 0x939   :  { %1183 = vst.msk [vmem:[%s2296_s7 + $0x18] sm:$0xff] %vm62_vm1, %v1177_v37 }
 0x93a   :  { %1182 = vst.msk [vmem:[%s2296_s7 + $0x10] sm:$0xff] %vm62_vm1, %v1172_v40 }
 0x93b   :  { %1695 = dma.done.wait [#allocation3], 512  }
 0x93c   :  { %1696 = vsyncadd [#allocation3], 4294966784 }
 0x93d   :  { %1203 = vsyncpa [#allocation3], 1 }

</bundles_post_ra>
